<compile_context>
chip_gen: v7x
topology: tpu7x:2x2x1
jax: 0.10.0
libtpu: 0.0.40
codegen_flags: <defaults>
</compile_context>

<pallas_src>
import functools

import jax
import jax.numpy as jnp
from jax.experimental import pallas as pl
from jax.experimental.pallas import tpu as pltpu


def autopad(k, p=None, d=1):
    if d > 1:
        k = d * (k - 1) + 1 if isinstance(k, int) else [d * (x - 1) + 1 for x in k]
    if p is None:
        p = k // 2 if isinstance(k, int) else [x // 2 for x in k]
    return p


def _make_kernel(k, Ho, nb):
    def kernel(x_ref, w_ref, shift_ref, o_ref):
        # x_ref:     (nb, Hp, W*c1)    H-halo-padded activations in the MXU dtype
        #                              (W padding is folded into the Toeplitz slab)
        # w_ref:     (k*W*c1, Wo*c2)   BN-scale-folded, K-fused Toeplitz weight slab
        # shift_ref: (1, Wo*c2)        folded BN shift, pre-tiled to the lane-dense layout (f32)
        # o_ref:     (nb, Ho, Wo*c2)   lane-dense output slab
        #
        # im2col along H: per batch element, lane-concatenate the k row-shifted slices so the
        # whole conv is ONE MXU matmul (M = nb*Ho, K = k*W*c1, N = Wo*c2) with no scratch stores.
        lhs = jnp.concatenate(
            [jnp.concatenate([x_ref[b, dy:dy + Ho, :] for dy in range(k)], axis=-1)
             for b in range(nb)],
            axis=0)                                                        # (nb*Ho, k*W*c1)

        acc = jnp.dot(lhs, w_ref[...],
                      preferred_element_type=jnp.float32)                  # (nb*Ho, Wo*c2) f32

        # Fused BatchNorm shift + SiLU epilogue, lane-dense, in f32 (VPU/EUP).
        z = acc + shift_ref[...]
        y = z * jax.nn.sigmoid(z)
        for b in range(nb):
            o_ref[b] = y[b * Ho:(b + 1) * Ho].astype(o_ref.dtype)

    return kernel


def build_fused_params(weight_oihw, gamma, beta, run_mean, run_var, *,
                       k, p, W, eps=1e-5, mxu_dtype=jnp.bfloat16):
    """Fold eval-mode BN into the conv weight and build the K-fused Toeplitz slab.

    Call once for static inference weights (hoisted out of the per-call path).
      R:          (k*W*c1, Wo*c2) in mxu_dtype -- sliding-window weight slab, BN scale folded in,
                                                  W zero-padding baked into the validity mask.
      shift_lane: (1, Wo*c2) f32               -- BN shift tiled to the lane-dense output layout.
    """
    c2, c1, _, _ = weight_oihw.shape
    Wo = W + 2 * p - k + 1

    inv_std = 1.0 / jnp.sqrt(run_var + eps)
    scale = gamma * inv_std                                    # (c2,)
    shift = beta - run_mean * scale                            # (c2,)

    # w_s[dy, dx, ci, co] = weight[co, ci, dy, dx] * scale[co]
    w_s = jnp.transpose(weight_oihw, (2, 3, 1, 0)) * scale[None, None, None, :]   # (k, k, c1, c2)

    # Toeplitz along W against UNPADDED input columns (left/right zero pad baked into the mask):
    #   R[(dy*W + w_in)*c1 + ci, w_out*c2 + co] = w_s[dy, w_in - w_out + p, ci, co]  if valid else 0
    w_in = jnp.arange(W)
    w_out = jnp.arange(Wo)
    dx = w_in[:, None] - w_out[None, :] + p                    # (W, Wo)
    valid = (dx >= 0) & (dx < k)
    R = w_s[:, jnp.clip(dx, 0, k - 1)]                         # (k, W, Wo, c1, c2)
    R = jnp.where(valid[None, :, :, None, None], R, 0.0)
    R = jnp.transpose(R, (0, 1, 3, 2, 4)).reshape(k * W * c1, Wo * c2).astype(mxu_dtype)

    shift_lane = jnp.tile(shift, Wo).reshape(1, Wo * c2).astype(jnp.float32)
    return R, shift_lane


def conv_bn_silu_apply(x_nchw, R, shift_lane, *, k, p, c2,
                       mxu_dtype=jnp.bfloat16, nb=None):
    """Apply the fused Conv+BN+SiLU given precomputed (R, shift_lane)."""
    N, c1, H, W = x_nchw.shape
    Hp = H + 2 * p
    Ho = Hp - k + 1
    Wo = W + 2 * p - k + 1
    Wc1, Woc2 = W * c1, Wo * c2
    assert R.shape == (k * Wc1, Woc2)

    if nb is None:
        # Fold batch elements into matmul M, targeting nb*Ho <= 256 (v6e/v7x MXU rows).
        nb = 1
        for cand in range(1, N + 1):
            if N % cand == 0 and cand * Ho <= 256:
                nb = cand
    assert N % nb == 0
    # TODO(synk): on v7x prefer N // nb to be a multiple of 2 so both TensorCores are loaded.

    # Single fused layout pass: NCHW -> (N, H, W*c1), H-halo pad, cast to the MXU dtype.
    # W padding is folded into R, so no W pad and no in-kernel padding scratch is needed.
    x = jnp.transpose(x_nchw, (0, 2, 3, 1)).reshape(N, H, Wc1)
    x = jnp.pad(x, ((0, 0), (p, p), (0, 0))).astype(mxu_dtype)             # (N, Hp, W*c1)

    kernel = _make_kernel(k, Ho, nb)

    out = pl.pallas_call(
        kernel,
        out_shape=jax.ShapeDtypeStruct((N, Ho, Woc2), jnp.float32),
        grid=(N // nb,),
        in_specs=[
            pl.BlockSpec((nb, Hp, Wc1), lambda n: (n, 0, 0)),
            pl.BlockSpec((k * Wc1, Woc2), lambda n: (0, 0)),
            pl.BlockSpec((1, Woc2), lambda n: (0, 0)),
        ],
        out_specs=pl.BlockSpec((nb, Ho, Woc2), lambda n: (n, 0, 0)),
        compiler_params=pltpu.CompilerParams(
            dimension_semantics=("parallel",),
        ),
    )(x, R, shift_lane)

    # (N, Ho, Wo*c2) -> NCHW
    return jnp.transpose(out.reshape(N, Ho, Wo, c2), (0, 3, 1, 2))


def conv_bn_silu(x_nchw, weight_oihw, gamma, beta, run_mean, run_var,
                 k, s=1, p=None, eps=1e-5, mxu_dtype=jnp.bfloat16, nb=None):
    """Conv2d(c1->c2, k, stride=1, pad=autopad, bias=False) -> BatchNorm2d(eval) -> SiLU."""
    assert s == 1, "this kernel implements the stride=1 path"
    p = autopad(k, p)
    W = x_nchw.shape[3]
    c2 = weight_oihw.shape[0]
    R, shift_lane = build_fused_params(weight_oihw, gamma, beta, run_mean, run_var,
                                       k=k, p=p, W=W, eps=eps, mxu_dtype=mxu_dtype)
    return conv_bn_silu_apply(x_nchw, R, shift_lane, k=k, p=p, c2=c2,
                              mxu_dtype=mxu_dtype, nb=nb)


def _reference(x_nchw, weight_oihw, gamma, beta, run_mean, run_var, k, p, eps=1e-5):
    conv = jax.lax.conv_general_dilated(
        x_nchw, weight_oihw, window_strides=(1, 1),
        padding=[(p, p), (p, p)],
        dimension_numbers=("NCHW", "OIHW", "NCHW"),
    )
    scale = (gamma / jnp.sqrt(run_var + eps)).reshape(1, -1, 1, 1)
    shift = (beta - run_mean * gamma / jnp.sqrt(run_var + eps)).reshape(1, -1, 1, 1)
    z = conv * scale + shift
    return z * jax.nn.sigmoid(z)


if __name__ == "__main__":
    # Module config: Conv(c1=4, c2=8, k=3, s=1) -> BatchNorm2d(8) -> SiLU
    c1, c2, k, s = 4, 8, 3, 1
    N, H, W = 2, 16, 16
    p = autopad(k)

    key = jax.random.PRNGKey(0)
    kx, kw, kg, kb, km, kv = jax.random.split(key, 6)

    x = jax.random.normal(kx, (N, c1, H, W), dtype=jnp.float32)
    weight = jax.random.normal(kw, (c2, c1, k, k), dtype=jnp.float32) * 0.1   # OIHW
    gamma = 1.0 + 0.1 * jax.random.normal(kg, (c2,), dtype=jnp.float32)
    beta = 0.1 * jax.random.normal(kb, (c2,), dtype=jnp.float32)
    run_mean = 0.1 * jax.random.normal(km, (c2,), dtype=jnp.float32)
    run_var = jnp.abs(1.0 + 0.1 * jax.random.normal(kv, (c2,), dtype=jnp.float32))

    ref = _reference(x, weight, gamma, beta, run_mean, run_var, k, p)

    # Default bf16 MXU path: fold weights/BN once (static inference params), jit only the apply.
    R_bf16, shift_lane = build_fused_params(weight, gamma, beta, run_mean, run_var,
                                            k=k, p=p, W=W, mxu_dtype=jnp.bfloat16)
    apply_bf16 = jax.jit(functools.partial(conv_bn_silu_apply, k=k, p=p, c2=c2,
                                           mxu_dtype=jnp.bfloat16))
    out_bf16 = jax.block_until_ready(apply_bf16(x, R_bf16, shift_lane))
    assert out_bf16.shape == (N, c2, H, W)
    assert jnp.allclose(out_bf16, ref, atol=2e-2, rtol=2e-2), "bf16 path mismatch vs reference"

    # f32 MXU path keeps the tight tolerance.
    out_f32 = jax.block_until_ready(
        conv_bn_silu(x, weight, gamma, beta, run_mean, run_var, k, s, mxu_dtype=jnp.float32))
    assert out_f32.shape == (N, c2, H, W)
    assert jnp.allclose(out_f32, ref, atol=1e-4, rtol=1e-4), "f32 path mismatch vs reference"

    print("KERNEL_OK")
</pallas_src>

<mosaic_0001>
module attributes {stable_mosaic.version = 11 : i64} {
  func.func @kernel(%arg0: i32, %arg1: memref<2x18x64xbf16, #tpu.memory_space<vmem>>, %arg2: memref<192x128xbf16, #tpu.memory_space<vmem>>, %arg3: memref<1x128xf32, #tpu.memory_space<vmem>>, %arg4: memref<2x16x128xf32, #tpu.memory_space<vmem>>) attributes {dimension_semantics = [#tpu.dimension_semantics<parallel>], iteration_bounds = array<i64: 1>, scalar_prefetch = 0 : i64, scratch_operands = 0 : i64, tpu.core_type = #tpu.core_type<tc>, window_params = [{transform_indices = @transform_0, window_bounds = array<i64: 2, 18, 64>}, {pipeline_mode = #tpu.pipeline_mode<synchronous>, transform_indices = @transform_1, window_bounds = array<i64: 192, 128>}, {pipeline_mode = #tpu.pipeline_mode<synchronous>, transform_indices = @transform_2, window_bounds = array<i64: 1, 128>}, {transform_indices = @transform_3, window_bounds = array<i64: 2, 16, 128>}]} {
    %c0 = arith.constant 0 : index
    %c0_0 = arith.constant 0 : index
    %c0_1 = arith.constant 0 : index
    %0 = vector.load %arg1[%c0, %c0_0, %c0_1] : memref<2x18x64xbf16, #tpu.memory_space<vmem>>, vector<1x16x64xbf16>
    %1 = vector.shape_cast %0 : vector<1x16x64xbf16> to vector<16x64xbf16>
    %c0_2 = arith.constant 0 : index
    %c1 = arith.constant 1 : index
    %c0_3 = arith.constant 0 : index
    %2 = vector.load %arg1[%c0_2, %c1, %c0_3] : memref<2x18x64xbf16, #tpu.memory_space<vmem>>, vector<1x16x64xbf16>
    %3 = vector.shape_cast %2 : vector<1x16x64xbf16> to vector<16x64xbf16>
    %c0_4 = arith.constant 0 : index
    %c2 = arith.constant 2 : index
    %c0_5 = arith.constant 0 : index
    %4 = vector.load %arg1[%c0_4, %c2, %c0_5] : memref<2x18x64xbf16, #tpu.memory_space<vmem>>, vector<1x16x64xbf16>
    %5 = vector.shape_cast %4 : vector<1x16x64xbf16> to vector<16x64xbf16>
    %6 = tpu.concatenate %1, %3, %5 in 1 : vector<16x64xbf16>, vector<16x64xbf16>, vector<16x64xbf16> -> vector<16x192xbf16>
    %c1_6 = arith.constant 1 : index
    %c0_7 = arith.constant 0 : index
    %c0_8 = arith.constant 0 : index
    %7 = vector.load %arg1[%c1_6, %c0_7, %c0_8] : memref<2x18x64xbf16, #tpu.memory_space<vmem>>, vector<1x16x64xbf16>
    %8 = vector.shape_cast %7 : vector<1x16x64xbf16> to vector<16x64xbf16>
    %c1_9 = arith.constant 1 : index
    %c1_10 = arith.constant 1 : index
    %c0_11 = arith.constant 0 : index
    %9 = vector.load %arg1[%c1_9, %c1_10, %c0_11] : memref<2x18x64xbf16, #tpu.memory_space<vmem>>, vector<1x16x64xbf16>
    %10 = vector.shape_cast %9 : vector<1x16x64xbf16> to vector<16x64xbf16>
    %c1_12 = arith.constant 1 : index
    %c2_13 = arith.constant 2 : index
    %c0_14 = arith.constant 0 : index
    %11 = vector.load %arg1[%c1_12, %c2_13, %c0_14] : memref<2x18x64xbf16, #tpu.memory_space<vmem>>, vector<1x16x64xbf16>
    %12 = vector.shape_cast %11 : vector<1x16x64xbf16> to vector<16x64xbf16>
    %13 = tpu.concatenate %8, %10, %12 in 1 : vector<16x64xbf16>, vector<16x64xbf16>, vector<16x64xbf16> -> vector<16x192xbf16>
    %14 = tpu.concatenate %6, %13 in 0 : vector<16x192xbf16>, vector<16x192xbf16> -> vector<32x192xbf16>
    %c0_15 = arith.constant 0 : index
    %c0_16 = arith.constant 0 : index
    %15 = vector.load %arg2[%c0_15, %c0_16] : memref<192x128xbf16, #tpu.memory_space<vmem>>, vector<192x128xbf16>
    %cst = arith.constant dense<0.000000e+00> : vector<32x128xf32>
    %16 = tpu.matmul %14, %15, %cst {dimension_numbers = #tpu.dot_dimension_numbers<[1], [0], [0], [1], [0, 0, 1, 1], [], []>} : vector<32x192xbf16>, vector<192x128xbf16>, vector<32x128xf32> -> vector<32x128xf32>
    %c0_17 = arith.constant 0 : index
    %c0_18 = arith.constant 0 : index
    %17 = vector.load %arg3[%c0_17, %c0_18] : memref<1x128xf32, #tpu.memory_space<vmem>>, vector<1x128xf32>
    %18 = vector.broadcast %17 : vector<1x128xf32> to vector<32x128xf32>
    %19 = arith.addf %16, %18 : vector<32x128xf32>
    %20 = arith.negf %19 : vector<32x128xf32>
    %21 = math.exp %20 : vector<32x128xf32>
    %cst_19 = arith.constant 1.000000e+00 : f32
    %22 = vector.broadcast %cst_19 : f32 to vector<32x128xf32>
    %23 = arith.addf %22, %21 : vector<32x128xf32>
    %24 = arith.divf %22, %23 : vector<32x128xf32>
    %25 = arith.mulf %19, %24 : vector<32x128xf32>
    %26 = vector.extract_strided_slice %25 {offsets = [0, 0], sizes = [16, 128], strides = [1, 1]} : vector<32x128xf32> to vector<16x128xf32>
    %c0_20 = arith.constant 0 : index
    %c0_21 = arith.constant 0 : index
    %c0_22 = arith.constant 0 : index
    %27 = vector.load %arg4[%c0_20, %c0_21, %c0_22] : memref<2x16x128xf32, #tpu.memory_space<vmem>>, vector<1x16x128xf32>
    %28 = vector.shape_cast %27 : vector<1x16x128xf32> to vector<16x128xf32>
    %29 = vector.shape_cast %26 : vector<16x128xf32> to vector<1x16x128xf32>
    tpu.vector_store %arg4[%c0_20, %c0_21, %c0_22], %29 {strides = array<i32>} : memref<2x16x128xf32, #tpu.memory_space<vmem>>, vector<1x16x128xf32>,
    %30 = vector.extract_strided_slice %25 {offsets = [16, 0], sizes = [16, 128], strides = [1, 1]} : vector<32x128xf32> to vector<16x128xf32>
    %c1_23 = arith.constant 1 : index
    %c0_24 = arith.constant 0 : index
    %c0_25 = arith.constant 0 : index
    %31 = vector.load %arg4[%c1_23, %c0_24, %c0_25] : memref<2x16x128xf32, #tpu.memory_space<vmem>>, vector<1x16x128xf32>
    %32 = vector.shape_cast %31 : vector<1x16x128xf32> to vector<16x128xf32>
    %33 = vector.shape_cast %30 : vector<16x128xf32> to vector<1x16x128xf32>
    tpu.vector_store %arg4[%c1_23, %c0_24, %c0_25], %33 {strides = array<i32>} : memref<2x16x128xf32, #tpu.memory_space<vmem>>, vector<1x16x128xf32>,
    return
  }
  func.func @transform_0(%arg0: i32) -> (i32, i32, i32) {
    %c0_i32 = arith.constant 0 : i32
    %c0_i32_0 = arith.constant 0 : i32
    %c0_i32_1 = arith.constant 0 : i32
    return %arg0, %c0_i32, %c0_i32_0 : i32, i32, i32
  }
  func.func @transform_1(%arg0: i32) -> (i32, i32) {
    %c0_i32 = arith.constant 0 : i32
    %c0_i32_0 = arith.constant 0 : i32
    %c0_i32_1 = arith.constant 0 : i32
    return %c0_i32, %c0_i32_0 : i32, i32
  }
  func.func @transform_2(%arg0: i32) -> (i32, i32) {
    %c0_i32 = arith.constant 0 : i32
    %c0_i32_0 = arith.constant 0 : i32
    %c0_i32_1 = arith.constant 0 : i32
    return %c0_i32, %c0_i32_0 : i32, i32
  }
  func.func @transform_3(%arg0: i32) -> (i32, i32, i32) {
    %c0_i32 = arith.constant 0 : i32
    %c0_i32_0 = arith.constant 0 : i32
    %c0_i32_1 = arith.constant 0 : i32
    return %arg0, %c0_i32, %c0_i32_0 : i32, i32, i32
  }
}

</mosaic_0001>

<bundles_post_ra>
// kernel: conv_bn_silu_apply.1
= control target key start
LH: loop header
LB: loop body
LE: loop exit
PB: predicated region body
PF: predicated region fallthrough
CT: control target
= control target key end

     0   :  { %vm27_vm0 = vsmask.f32 7424  ;;  %v375_v2 = vmov 0   ;;  %s376_s30 = smov 64   ;;  %vm45_vm1 = vcmask 1046528   ;;  %vm49_vm2 = vcmask 523264   ;;  %s512_s0 = inlined_call_operand.vmem [shape: bf16[2,18,64], index: 0, kind: input, shape index: {}]   ;;  %s513_s1 = inlined_call_operand.vmem [shape: bf16[192,128], index: 1, kind: input, shape index: {}]   ;;  %s514_s2 = inlined_call_operand.vmem [shape: f32[1,128], index: 2, kind: input, shape index: {}]   ;;  %s515_s3 = inlined_call_operand.vmem [shape: f32[2,16,128], index: 3, kind: output, shape index: {}]  }
   0x1   :  { %v15_v0 = vld [vmem:[%s512_s0] sm:$0xf]  ;;  %v16_v1 = vld [vmem:[%s512_s0 + $0x4] sm:$0xf]  ;;  %198 = vmatprep.subr.bf16.mxu0 %v375_v2  ;;  %315 = vmatprep.subr.bf16.mxu1 %v375_v2  ;;  %v287_v5 = vld [vmem:[%s512_s0 + $0xc] sm:$0xf] }
   0x2   :  { %v405_v3 = vcombine.low %v15_v0, %v16_v1  ;;  %v342_v4 = vld [vmem:[%s512_s0 + $0x8] ss:$0 sps:$4 sm:$0x11]   ;;  %v345_v6 = vld [vmem:[%s513_s1] sm:$0xff]   ;;  %v288_v7 = vld [vmem:[%s512_s0 + $0x10] sm:$0xf] }
   0x3   :  { %v36_v10 = vshll.u32 %v342_v4, 16  ;;  %v421_v11 = vcombine.low %v287_v5, %v288_v7  ;;  %v344_v12 = vld [vmem:[%s512_s0 + $0x14] ss:$0 sps:$4 sm:$0x11]   ;;  %199 = vmatpush1.bf16.msra.mxu0 %v345_v6  ;;  %327 = vmatpush1.bf16.msra.mxu1 %v345_v6  ;;  %v346_v17 = vld [vmem:[%s513_s1 + $0x8] sm:$0xff]   ;;  %v348_v26 = vld [vmem:[%s513_s1 + $0x18] sm:$0xff]  }
   0x4   :  { %v29_v8 = vshrl.u32 %v405_v3, 16  ;;  %v31_v9 = vshll.u32 %v405_v3, 16  ;;  %200 = vmatprep.subr.bf16.mxu0 %v375_v2  ;;  %316 = vmatprep.subr.bf16.mxu1 %v375_v2  ;;  %v74_v18 = vshll.u32 %v344_v12, 16  ;;  %v347_v21 = vld [vmem:[%s513_s1 + $0x10] sm:$0xff]   ;;  %v349_v27 = vld [vmem:[%s513_s1 + $0x20] sm:$0xff]   ;;  %v47_v30 = vrot.slane %v342_v4, 1 }
   0x5   :  { %v38_v14 = vrot.slane %v36_v10, 1  ;;  %v67_v15 = vshrl.u32 %v421_v11, 16  ;;  %v69_v16 = vshll.u32 %v421_v11, 16  ;;  %v18_v28 = vld [vmem:[%s512_s0] sm:$0xe]  ;;  %v84_v33 = vrot.slane %v344_v12, 1 }
   0x6   :  { %v33_v13 = vrot.slane %v31_v9, 1  ;;  %v76_v22 = vrot.slane %v74_v18, 1  ;;  %v286_v29 = vcombine.low %v18_v28, %v16_v1  ;;  %v290_v31 = vld [vmem:[%s512_s0 + $0xc] sm:$0xe]  ;;  %v351_v39 = vld [vmem:[%s513_s1 + $0x30] sm:$0xff]   ;;  %v352_v40 = vld [vmem:[%s513_s1 + $0x38] sm:$0xff]  }
   0x7   :  { %v71_v20 = vrot.slane %v69_v16, 1  ;;  %201 = vmatpush1.bf16.msra.mxu0 %v346_v17  ;;  %328 = vmatpush1.bf16.msra.mxu1 %v346_v17  ;;  %v293_v32 = vcombine.low %v290_v31, %v288_v7  ;;  %v350_v35 = vld [vmem:[%s513_s1 + $0x28] sm:$0xff]   ;;  %v353_v41 = vld [vmem:[%s513_s1 + $0x40] sm:$0xff]   ;;  %v355_v43 = vld [vmem:[%s513_s1 + $0x50] sm:$0xff]  }
   0x8   :  { %v34_v19 = vor.u32 %v33_v13, %v29_v8  ;;  %202 = vmatprep.subr.bf16.mxu0 %v375_v2  ;;  %317 = vmatprep.subr.bf16.mxu1 %v375_v2  ;;  %v46_v34 = vrot.slane %v286_v29, 1  ;;  %v354_v42 = vld [vmem:[%s513_s1 + $0x48] sm:$0xff]   ;;  %v356_v44 = vld [vmem:[%s513_s1 + $0x58] sm:$0xff]   ;;  %v294_v49 = vld [vmem:[%s514_s2] ss:$0 sm:$0xff] }
   0x9   :  { %v72_v24 = vor.u32 %v71_v20, %v67_v15  ;;  %v83_v36 = vrot.slane %v293_v32, 1 }
   0xa   :  { %v39_v23 = vsel %vm27_vm0, %v34_v19, %v38_v14  ;;  %v48_v37 = vsel %vm45_vm1, %v46_v34, %v47_v30 }
   0xb   :  { %40 = vrot.lane.b32.xlu0 %v39_v23, %s376_s30  ;;  %v77_v25 = vsel %vm27_vm0, %v72_v24, %v76_v22  ;;  %203 = vmatpush1.bf16.msra.mxu0 %v347_v21  ;;  %v85_v38 = vsel %vm45_vm1, %v83_v36, %v84_v33 }
   0xc   :  { %329 = vmatpush1.bf16.msra.mxu1 %v347_v21  ;;  %204 = vmatprep.subr.bf16.mxu0 %v375_v2 }
   0xd   :  { %318 = vmatprep.subr.bf16.mxu1 %v375_v2  ;;  %307 = vmatprep.mubr.msk.bf16.mxu0 %vm49_vm2, %v48_v37 }
   0xe   :  { %308 = vmatprep.mubr.msk.bf16.mxu1 %vm49_vm2, %v85_v38 }
   0xf   :  { %78 = vrot.lane.b32.xlu0 %v77_v25, %s376_s30  ;;  %205 = vmatpush1.bf16.msra.mxu0 %v348_v26 }
  0x10   :  { %330 = vmatpush1.bf16.msra.mxu1 %v348_v26  ;;  %206 = vmatprep.subr.bf16.mxu0 %v375_v2 }
  0x11   :  { %319 = vmatprep.subr.bf16.mxu1 %v375_v2 }
  0x13   :  { %207 = vmatpush1.bf16.msra.mxu0 %v349_v27 }
  0x14   :  { %331 = vmatpush1.bf16.msra.mxu1 %v349_v27  ;;  %208 = vmatprep.subr.bf16.mxu0 %v375_v2 }
  0x15   :  { %320 = vmatprep.subr.bf16.mxu1 %v375_v2 }
  0x17   :  { %209 = vmatpush1.bf16.msra.mxu0 %v350_v35 }
  0x18   :  { %332 = vmatpush1.bf16.msra.mxu1 %v350_v35  ;;  %210 = vmatprep.subr.bf16.mxu0 %v375_v2 }
  0x19   :  { %321 = vmatprep.subr.bf16.mxu1 %v375_v2 }
  0x1b   :  { %211 = vmatpush1.bf16.msra.mxu0 %v351_v39 }
  0x1c   :  { %333 = vmatpush1.bf16.msra.mxu1 %v351_v39  ;;  %212 = vmatprep.subr.bf16.mxu0 %v375_v2 }
  0x1d   :  { %322 = vmatprep.subr.bf16.mxu1 %v375_v2 }
  0x1f   :  { %213 = vmatpush1.bf16.msra.mxu0 %v352_v40 }
  0x20   :  { %334 = vmatpush1.bf16.msra.mxu1 %v352_v40  ;;  %214 = vmatprep.subr.bf16.mxu0 %v375_v2 }
  0x21   :  { %323 = vmatprep.subr.bf16.mxu1 %v375_v2 }
  0x23   :  { %215 = vmatpush1.bf16.msra.mxu0 %v353_v41 }
  0x24   :  { %335 = vmatpush1.bf16.msra.mxu1 %v353_v41  ;;  %216 = vmatprep.subr.bf16.mxu0 %v375_v2 }
  0x25   :  { %324 = vmatprep.subr.bf16.mxu1 %v375_v2 }
  0x27   :  { %217 = vmatpush1.bf16.msra.mxu0 %v354_v42 }
  0x28   :  { %336 = vmatpush1.bf16.msra.mxu1 %v354_v42  ;;  %218 = vmatprep.subr.bf16.mxu0 %v375_v2 }
  0x29   :  { %325 = vmatprep.subr.bf16.mxu1 %v375_v2 }
  0x2b   :  { %219 = vmatpush1.bf16.msra.mxu0 %v355_v43 }
  0x2c   :  { %337 = vmatpush1.bf16.msra.mxu1 %v355_v43  ;;  %220 = vmatprep.subr.bf16.mxu0 %v375_v2 }
  0x2d   :  { %326 = vmatprep.subr.bf16.mxu1 %v375_v2 }
  0x2f   :  { %221 = vmatpush1.bf16.msra.mxu0 %v356_v44 }
  0x30   :  { %338 = vmatpush1.bf16.msra.mxu1 %v356_v44 }
  0x7d   :  { %v41_v45 = vpop.permute.xlu0 %40 }
  0x7e   :  { %v51_v46 = vsel %vm49_vm2, %v405_v3, %v41_v45 }
  0x7f   :  { %231 = vmatmul.mubr.bf16.vlgmr.msra.gmra.mrb[0].mxu0 %v51_v46 }
  0x81   :  { %v79_v47 = vpop.permute.xlu0 %78 }
  0x82   :  { %v87_v48 = vsel %vm49_vm2, %v421_v11, %v79_v47 }
  0x83   :  { %239 = vmatmul.mubr.bf16.vlgmr.msra.gmra.mrb[0].mxu1 %v87_v48 }
 0x152   :  { %v232_v50 = vpop.f32.mrb[0].mxu0 }
 0x153   :  { %v233_v51 = vadd.f32 %v294_v49, %v232_v50  ;;  %v234_v52 = vpop.f32.mrb[1].mxu0 }
 0x154   :  { %v235_v53 = vpop.f32.mrb[2].mxu0 }
 0x155   :  { %v309_v54 = vmul.f32 -1.442695, %v233_v51  ;;  %v236_v55 = vadd.f32 %v294_v49, %v235_v53  ;;  %v237_v56 = vpop.f32.mrb[3].mxu0 }
 0x156   :  { %v240_v57 = vpop.f32.mrb[0].mxu1 }
 0x157   :  { %359 = vpow2.f32 %v309_v54  ;;  %v310_v58 = vmul.f32 -1.442695, %v236_v55  ;;  %v241_v59 = vadd.f32 %v294_v49, %v240_v57  ;;  %v242_v60 = vpop.f32.mrb[1].mxu1 }
 0x158   :  { %v243_v61 = vpop.f32.mrb[2].mxu1 }
 0x159   :  { %361 = vpow2.f32 %v310_v58  ;;  %v311_v62 = vmul.f32 -1.442695, %v241_v59  ;;  %v244_v63 = vadd.f32 %v294_v49, %v243_v61  ;;  %v245_v0 = vpop.f32.mrb[3].mxu1 }
 0x15b   :  { %363 = vpow2.f32 %v311_v62  ;;  %v312_v1 = vmul.f32 -1.442695, %v244_v63 }
 0x15d   :  { %365 = vpow2.f32 %v312_v1 }
 0x161   :  { %v360_v2 = vpop.eup %359 }
 0x162   :  { %v259_v3 = vadd.f32 1.0, %v360_v2 }
 0x163   :  { %v362_v4 = vpop.eup %361 }
 0x164   :  { %367 = vrcp.f32 %v259_v3  ;;  %v260_v5 = vadd.f32 1.0, %v362_v4 }
 0x165   :  { %v364_v6 = vpop.eup %363 }
 0x166   :  { %369 = vrcp.f32 %v260_v5  ;;  %v261_v7 = vadd.f32 1.0, %v364_v6 }
 0x167   :  { %v366_v8 = vpop.eup %365 }
 0x168   :  { %371 = vrcp.f32 %v261_v7  ;;  %v262_v9 = vadd.f32 1.0, %v366_v8 }
 0x16a   :  { %373 = vrcp.f32 %v262_v9 }
 0x16e   :  { %v368_v10 = vpop.eup %367 }
 0x16f   :  { %v271_v11 = vmul.f32 %v368_v10, %v233_v51 }
 0x170   :  { %v370_v12 = vpop.eup %369 }
 0x171   :  { %275 = vst [vmem:[%s515_s3] sm:$0xff] %v271_v11  ;;  %v272_v13 = vmul.f32 %v370_v12, %v236_v55 }
 0x172   :  { %v372_v14 = vpop.eup %371 }
 0x173   :  { %276 = vst [vmem:[%s515_s3 + $0x8] sm:$0xff] %v272_v13  ;;  %v273_v15 = vmul.f32 %v372_v14, %v241_v59 }
 0x174   :  { %v374_v16 = vpop.eup %373 }
 0x175   :  { %313 = vst [vmem:[%s515_s3 + $0x10] sm:$0xff] %v273_v15  ;;  %v274_v17 = vmul.f32 %v374_v16, %v244_v63 }
 0x177   :  { %314 = vst [vmem:[%s515_s3 + $0x18] sm:$0xff] %v274_v17 }

</bundles_post_ra>
